<compile_context>
chip_gen: v7x
topology: tpu7x:2x2x1
jax: 0.10.0
libtpu: 0.0.40
codegen_flags: <defaults>
</compile_context>

<pallas_src>
import jax
import jax.numpy as jnp
from jax.experimental import pallas as pl
from jax.experimental.pallas import tpu as pltpu


def _round_up(n, m):
    return ((n + m - 1) // m) * m


def _default_pack():
    """Packing factor: 4 for 256-wide MXU (v6e/v7x), 2 for 128-wide (<= v5)."""
    try:
        kind = jax.devices()[0].device_kind.lower()
    except Exception:
        return 4
    for tag in ("v2", "v3", "v4", "v5"):
        if tag in kind:
            return 2
    return 4


def ldr_ncf_kernel(z_ref, w1_ref, b1_ref, wh_ref, bh_ref, w2_ref, wdc_ref, out_ref):
    """One batch tile. z_ref: [TBP, P*2K] bf16, P samples packed per lane row.

    All weights are block-diagonal / lane-tiled so each matmul computes the
    corresponding layer for all P packed samples at once (full MXU width).
    """
    # h1 = relu(z @ W1_blockdiag + b1_tiled)               -> [TBP, P*K] f32
    h1 = jnp.dot(z_ref[...], w1_ref[...], preferred_element_type=jnp.float32)
    h1 = jnp.maximum(h1 + b1_ref[...], 0.0)
    h1b = h1.astype(wh_ref.dtype)                           # bf16, reused twice

    # heads = relu(h1 @ [wd1|wc1]_blockdiag + [bd1|bc1])    -> [TBP, P*2K] f32
    heads = jnp.dot(h1b, wh_ref[...], preferred_element_type=jnp.float32)
    heads = jnp.maximum(heads + bh_ref[...], 0.0)
    headsb = heads.astype(wdc_ref.dtype)

    # Width-1 output projections as tiny block-diagonal matmuls, emitted as a
    # single lane-packed [TBP, 3P] block: [out_0..P-1 | dom_0..P-1 | cls_0..P-1].
    out_lanes = jnp.dot(h1b, w2_ref[...], preferred_element_type=jnp.float32)      # [TBP, P]
    dc_lanes = jnp.dot(headsb, wdc_ref[...], preferred_element_type=jnp.float32)   # [TBP, 2P]
    out_ref[...] = jnp.concatenate([out_lanes, dc_lanes], axis=1)


def prepare_params(params, pack=None, compute_dtype=jnp.bfloat16):
    """One-time weight prep (call once, outside the per-step path).

    Returns device arrays only:
      W, H   : bf16 embedding tables (halves gather HBM traffic)
      w1, wh : block-diagonal fused matmul weights (bf16)
      b1, bh : lane-tiled biases (f32)
      w2, wdc: block-diagonal width-1 output projections (bf16)
    """
    P = _default_pack() if pack is None else pack
    K = params["w1"].shape[1]
    eye = jnp.eye(P, dtype=jnp.float32)

    whcat = jnp.concatenate([params["wd1"], params["wc1"]], axis=1)      # [K, 2K]
    bhcat = jnp.concatenate([params["bd1"], params["bc1"]], axis=1)      # [1, 2K]
    zk1 = jnp.zeros((K, 1), jnp.float32)
    wd_col = jnp.concatenate([params["wd"], zk1], axis=0)                # [2K, 1]
    wc_col = jnp.concatenate([zk1, params["wc"]], axis=0)                # [2K, 1]

    return {
        "W": params["W"].astype(compute_dtype),
        "H": params["H"].astype(compute_dtype),
        "w1": jnp.kron(eye, params["w1"]).astype(compute_dtype),         # [P*2K, P*K]
        "b1": jnp.tile(params["b1"], (1, P)).astype(jnp.float32),        # [1, P*K]
        "wh": jnp.kron(eye, whcat).astype(compute_dtype),                # [P*K, P*2K]
        "bh": jnp.tile(bhcat, (1, P)).astype(jnp.float32),               # [1, P*2K]
        "w2": jnp.kron(eye, params["w2"]).astype(compute_dtype),         # [P*K, P]
        "wdc": jnp.concatenate(
            [jnp.kron(eye, wd_col), jnp.kron(eye, wc_col)],
            axis=1).astype(compute_dtype),                               # [P*2K, 2P]
    }


def _choose_tile(b_rows, block_b, P):
    """Packed-row tile size: multiple of 16, big (amortize per-step overhead),
    but keep >= ~8 grid steps for large batches (v7x has 2 TensorCores)."""
    tbp = _round_up(max(16, block_b // P), 16)
    tbp = min(tbp, b_rows)                 # b_rows is already a multiple of 16
    if b_rows >= 8 * 256:
        tbp = min(tbp, _round_up(pl.cdiv(b_rows, 8), 16))
    return tbp


def ldr_ncf_forward(x, params, prep=None, is_training=False, block_b=8192):
    """x: [B, 2] int32 (user_idx, item_idx). Same outputs as PyTorch forward()."""
    if prep is None:
        prep = prepare_params(params)
    P = prep["w2"].shape[1]
    K = prep["w1"].shape[1] // P
    B = x.shape[0]
    user_idx = x[:, 0]
    item_idx = x[:, 1]

    # Pad only the tiny index vectors (index 0 is always valid) so the packed
    # reshape is exact and the packed-row count is a multiple of 16.  No
    # full-array jnp.pad over the embedding streams.
    B_pad = _round_up(B, 16 * P)
    if B_pad != B:
        user_idx = jnp.pad(user_idx, (0, B_pad - B))
        item_idx = jnp.pad(item_idx, (0, B_pad - B))

    # Gather straight into the concatenated [B_pad, 2K] bf16 layout, then a
    # free row-major reshape packs P samples per lane row.
    # TODO(synk): for a pure-inference path the gather could be fused into the
    # kernel via scalar-prefetched indices + manual DMA; kept in XLA since
    # per-row DMAs at K=32 bf16 are only 64B.
    z = jnp.concatenate([jnp.take(prep["W"], user_idx, axis=0),
                         jnp.take(prep["H"], item_idx, axis=0)], axis=1)
    b_rows = B_pad // P
    z = z.reshape(b_rows, P * 2 * K)

    tbp = _choose_tile(b_rows, block_b, P)
    grid = (pl.cdiv(b_rows, tbp),)

    def _const(shape):
        # Weights stay VMEM-resident across all grid steps.
        return pl.BlockSpec(shape, lambda i: (0, 0))

    packed = pl.pallas_call(
        ldr_ncf_kernel,
        out_shape=jax.ShapeDtypeStruct((b_rows, 3 * P), jnp.float32),
        grid=grid,
        in_specs=[
            pl.BlockSpec((tbp, P * 2 * K), lambda i: (i, 0)),   # packed z tile
            _const((P * 2 * K, P * K)),                         # block-diag w1
            _const((1, P * K)),                                 # tiled b1
            _const((P * K, P * 2 * K)),                         # block-diag [wd1|wc1]
            _const((1, P * 2 * K)),                             # tiled [bd1|bc1]
            _const((P * K, P)),                                 # block-diag w2
            _const((P * 2 * K, 2 * P)),                         # block-diag [wd ; wc]
        ],
        out_specs=pl.BlockSpec((tbp, 3 * P), lambda i: (i, 0)),
        compiler_params=pltpu.CompilerParams(
            dimension_semantics=("parallel",),                  # megacore shard (v7x)
            vmem_limit_bytes=32 * 1024 * 1024,                  # safe vs v7x's 64 MiB
        ),
    )(z, prep["w1"], prep["b1"], prep["wh"], prep["bh"], prep["w2"], prep["wdc"])

    out = packed[:, 0:P].reshape(-1, 1)[:B]
    dom = packed[:, P:2 * P].reshape(-1, 1)[:B]
    cls = packed[:, 2 * P:3 * P].reshape(-1, 1)[:B]
    if is_training:
        # nn.Embedding outputs in the module are f32; keep f32 residual returns.
        U_emb = jnp.take(params["W"], x[:, 0], axis=0)
        V_emb = jnp.take(params["H"], x[:, 1], axis=0)
        return out, dom, cls, U_emb, V_emb
    return out


def init_params(key, num_users, num_items, embedding_k=32):
    ks = jax.random.split(key, 11)
    K = embedding_k

    def lin(k, fan_in, fan_out):
        bound = 1.0 / jnp.sqrt(fan_in)
        return jax.random.uniform(k, (fan_in, fan_out), jnp.float32, -bound, bound)

    def bias(k, fan_in, fan_out):
        bound = 1.0 / jnp.sqrt(fan_in)
        return jax.random.uniform(k, (1, fan_out), jnp.float32, -bound, bound)

    return {
        "W": jax.random.normal(ks[0], (num_users, K), jnp.float32),
        "H": jax.random.normal(ks[1], (num_items, K), jnp.float32),
        "w1": lin(ks[2], 2 * K, K), "b1": bias(ks[3], 2 * K, K),
        "w2": lin(ks[4], K, 1),                              # linear_2, no bias
        "wd1": lin(ks[5], K, K), "bd1": bias(ks[6], K, K),
        "wd": lin(ks[7], K, 1),                              # domain_linear, no bias
        "wc1": lin(ks[8], K, K), "bc1": bias(ks[9], K, K),
        "wc": lin(ks[10], K, 1),                             # class_linear, no bias
    }


def reference_forward(x, params):
    """Pure-JAX f32 reference mirroring the PyTorch module."""
    U = jnp.take(params["W"], x[:, 0], axis=0)
    V = jnp.take(params["H"], x[:, 1], axis=0)
    z = jnp.concatenate([U, V], axis=1)
    h1 = jnp.maximum(z @ params["w1"] + params["b1"], 0.0)
    out = h1 @ params["w2"]
    dh = jnp.maximum(h1 @ params["wd1"] + params["bd1"], 0.0)
    dom = dh @ params["wd"]
    ch = jnp.maximum(h1 @ params["wc1"] + params["bc1"], 0.0)
    cls = ch @ params["wc"]
    return out, dom, cls, U, V


def _check(x, params, prep, block_b):
    out, dom, cls, U_emb, V_emb = ldr_ncf_forward(
        x, params, prep=prep, is_training=True, block_b=block_b)
    jax.block_until_ready((out, dom, cls, U_emb, V_emb))
    ro, rd, rc, ru, rv = reference_forward(x, params)
    # bf16 embeddings/weights inside the kernel -> loose tolerance vs f32 ref.
    tol = dict(atol=5e-2, rtol=5e-2)
    assert jnp.allclose(out, ro, **tol), "out mismatch"
    assert jnp.allclose(dom, rd, **tol), "domain_out mismatch"
    assert jnp.allclose(cls, rc, **tol), "class_out mismatch"
    assert jnp.allclose(U_emb, ru) and jnp.allclose(V_emb, rv), "embedding mismatch"


if __name__ == "__main__":
    num_users, num_items, K = 16, 24, 32
    key = jax.random.PRNGKey(0)
    pkey, ukey, ikey, ukey2, ikey2 = jax.random.split(key, 5)
    params = init_params(pkey, num_users, num_items, K)

    prep_auto = prepare_params(params)            # P=4 on v6e/v7x, P=2 on <=v5
    prep_p2 = prepare_params(params, pack=2)      # also exercise the 128-wide path

    # Small batch (single tile, packed-row padding path).
    B = 8
    x = jnp.concatenate([
        jax.random.randint(ukey, (B, 1), 0, num_users, jnp.int32),
        jax.random.randint(ikey, (B, 1), 0, num_items, jnp.int32)], axis=1)
    _check(x, params, prep_auto, block_b=8192)

    # Larger non-multiple batch: multi-step grid with a ragged last block.
    B2 = 300
    x2 = jnp.concatenate([
        jax.random.randint(ukey2, (B2, 1), 0, num_users, jnp.int32),
        jax.random.randint(ikey2, (B2, 1), 0, num_items, jnp.int32)], axis=1)
    _check(x2, params, prep_auto, block_b=128)
    _check(x2, params, prep_p2, block_b=128)

    # Inference path (is_training=False returns only `out`).
    pred = ldr_ncf_forward(x2, params, prep=prep_auto)
    jax.block_until_ready(pred)

    print("KERNEL_OK")
</pallas_src>

<mosaic_0001>
module attributes {stable_mosaic.version = 11 : i64} {
  func.func @ldr_ncf_kernel(%arg0: i32, %arg1: memref<16x256xbf16, #tpu.memory_space<vmem>>, %arg2: memref<256x128xbf16, #tpu.memory_space<vmem>>, %arg3: memref<1x128xf32, #tpu.memory_space<vmem>>, %arg4: memref<128x256xbf16, #tpu.memory_space<vmem>>, %arg5: memref<1x256xf32, #tpu.memory_space<vmem>>, %arg6: memref<128x4xbf16, #tpu.memory_space<vmem>>, %arg7: memref<256x8xbf16, #tpu.memory_space<vmem>>, %arg8: memref<16x12xf32, #tpu.memory_space<vmem>>) attributes {dimension_semantics = [#tpu.dimension_semantics<parallel>], iteration_bounds = array<i64: 1>, scalar_prefetch = 0 : i64, scratch_operands = 0 : i64, tpu.core_type = #tpu.core_type<tc>, window_params = [{transform_indices = @transform_0, window_bounds = array<i64: 16, 256>}, {pipeline_mode = #tpu.pipeline_mode<synchronous>, transform_indices = @transform_1, window_bounds = array<i64: 256, 128>}, {pipeline_mode = #tpu.pipeline_mode<synchronous>, transform_indices = @transform_2, window_bounds = array<i64: 1, 128>}, {pipeline_mode = #tpu.pipeline_mode<synchronous>, transform_indices = @transform_3, window_bounds = array<i64: 128, 256>}, {pipeline_mode = #tpu.pipeline_mode<synchronous>, transform_indices = @transform_4, window_bounds = array<i64: 1, 256>}, {pipeline_mode = #tpu.pipeline_mode<synchronous>, transform_indices = @transform_5, window_bounds = array<i64: 128, 4>}, {pipeline_mode = #tpu.pipeline_mode<synchronous>, transform_indices = @transform_6, window_bounds = array<i64: 256, 8>}, {transform_indices = @transform_7, window_bounds = array<i64: 16, 12>}]} {
    %c0 = arith.constant 0 : index
    %c0_0 = arith.constant 0 : index
    %0 = vector.load %arg1[%c0, %c0_0] : memref<16x256xbf16, #tpu.memory_space<vmem>>, vector<16x256xbf16>
    %c0_1 = arith.constant 0 : index
    %c0_2 = arith.constant 0 : index
    %1 = vector.load %arg2[%c0_1, %c0_2] : memref<256x128xbf16, #tpu.memory_space<vmem>>, vector<256x128xbf16>
    %cst = arith.constant dense<0.000000e+00> : vector<16x128xf32>
    %2 = tpu.matmul %0, %1, %cst {dimension_numbers = #tpu.dot_dimension_numbers<[1], [0], [0], [1], [0, 0, 1, 1], [], []>} : vector<16x256xbf16>, vector<256x128xbf16>, vector<16x128xf32> -> vector<16x128xf32>
    %c0_3 = arith.constant 0 : index
    %c0_4 = arith.constant 0 : index
    %3 = vector.load %arg3[%c0_3, %c0_4] : memref<1x128xf32, #tpu.memory_space<vmem>>, vector<1x128xf32>
    %4 = vector.broadcast %3 : vector<1x128xf32> to vector<16x128xf32>
    %5 = arith.addf %2, %4 : vector<16x128xf32>
    %cst_5 = arith.constant 0.000000e+00 : f32
    %6 = vector.broadcast %cst_5 : f32 to vector<16x128xf32>
    %7 = arith.maximumf %5, %6 : vector<16x128xf32>
    %8 = arith.truncf %7 : vector<16x128xf32> to vector<16x128xbf16>
    %c0_6 = arith.constant 0 : index
    %c0_7 = arith.constant 0 : index
    %9 = vector.load %arg4[%c0_6, %c0_7] : memref<128x256xbf16, #tpu.memory_space<vmem>>, vector<128x256xbf16>
    %cst_8 = arith.constant dense<0.000000e+00> : vector<16x256xf32>
    %10 = tpu.matmul %8, %9, %cst_8 {dimension_numbers = #tpu.dot_dimension_numbers<[1], [0], [0], [1], [0, 0, 1, 1], [], []>} : vector<16x128xbf16>, vector<128x256xbf16>, vector<16x256xf32> -> vector<16x256xf32>
    %c0_9 = arith.constant 0 : index
    %c0_10 = arith.constant 0 : index
    %11 = vector.load %arg5[%c0_9, %c0_10] : memref<1x256xf32, #tpu.memory_space<vmem>>, vector<1x256xf32>
    %12 = vector.broadcast %11 : vector<1x256xf32> to vector<16x256xf32>
    %13 = arith.addf %10, %12 : vector<16x256xf32>
    %cst_11 = arith.constant 0.000000e+00 : f32
    %14 = vector.broadcast %cst_11 : f32 to vector<16x256xf32>
    %15 = arith.maximumf %13, %14 : vector<16x256xf32>
    %16 = arith.truncf %15 : vector<16x256xf32> to vector<16x256xbf16>
    %c0_12 = arith.constant 0 : index
    %c0_13 = arith.constant 0 : index
    %17 = vector.load %arg6[%c0_12, %c0_13] : memref<128x4xbf16, #tpu.memory_space<vmem>>, vector<128x4xbf16>
    %cst_14 = arith.constant dense<0.000000e+00> : vector<16x4xf32>
    %18 = tpu.matmul %8, %17, %cst_14 {dimension_numbers = #tpu.dot_dimension_numbers<[1], [0], [0], [1], [0, 0, 1, 1], [], []>} : vector<16x128xbf16>, vector<128x4xbf16>, vector<16x4xf32> -> vector<16x4xf32>
    %c0_15 = arith.constant 0 : index
    %c0_16 = arith.constant 0 : index
    %19 = vector.load %arg7[%c0_15, %c0_16] : memref<256x8xbf16, #tpu.memory_space<vmem>>, vector<256x8xbf16>
    %cst_17 = arith.constant dense<0.000000e+00> : vector<16x8xf32>
    %20 = tpu.matmul %16, %19, %cst_17 {dimension_numbers = #tpu.dot_dimension_numbers<[1], [0], [0], [1], [0, 0, 1, 1], [], []>} : vector<16x256xbf16>, vector<256x8xbf16>, vector<16x8xf32> -> vector<16x8xf32>
    %21 = tpu.concatenate %18, %20 in 1 : vector<16x4xf32>, vector<16x8xf32> -> vector<16x12xf32>
    %c0_18 = arith.constant 0 : index
    %c0_19 = arith.constant 0 : index
    %22 = vector.load %arg8[%c0_18, %c0_19] : memref<16x12xf32, #tpu.memory_space<vmem>>, vector<16x12xf32>
    tpu.vector_store %arg8[%c0_18, %c0_19], %21 {strides = array<i32>} : memref<16x12xf32, #tpu.memory_space<vmem>>, vector<16x12xf32>,
    return
  }
  func.func @transform_0(%arg0: i32) -> (i32, i32) {
    %c0_i32 = arith.constant 0 : i32
    %c0_i32_0 = arith.constant 0 : i32
    return %arg0, %c0_i32 : i32, i32
  }
  func.func @transform_1(%arg0: i32) -> (i32, i32) {
    %c0_i32 = arith.constant 0 : i32
    %c0_i32_0 = arith.constant 0 : i32
    %c0_i32_1 = arith.constant 0 : i32
    return %c0_i32, %c0_i32_0 : i32, i32
  }
  func.func @transform_2(%arg0: i32) -> (i32, i32) {
    %c0_i32 = arith.constant 0 : i32
    %c0_i32_0 = arith.constant 0 : i32
    %c0_i32_1 = arith.constant 0 : i32
    return %c0_i32, %c0_i32_0 : i32, i32
  }
  func.func @transform_3(%arg0: i32) -> (i32, i32) {
    %c0_i32 = arith.constant 0 : i32
    %c0_i32_0 = arith.constant 0 : i32
    %c0_i32_1 = arith.constant 0 : i32
    return %c0_i32, %c0_i32_0 : i32, i32
  }
  func.func @transform_4(%arg0: i32) -> (i32, i32) {
    %c0_i32 = arith.constant 0 : i32
    %c0_i32_0 = arith.constant 0 : i32
    %c0_i32_1 = arith.constant 0 : i32
    return %c0_i32, %c0_i32_0 : i32, i32
  }
  func.func @transform_5(%arg0: i32) -> (i32, i32) {
    %c0_i32 = arith.constant 0 : i32
    %c0_i32_0 = arith.constant 0 : i32
    %c0_i32_1 = arith.constant 0 : i32
    return %c0_i32, %c0_i32_0 : i32, i32
  }
  func.func @transform_6(%arg0: i32) -> (i32, i32) {
    %c0_i32 = arith.constant 0 : i32
    %c0_i32_0 = arith.constant 0 : i32
    %c0_i32_1 = arith.constant 0 : i32
    return %c0_i32, %c0_i32_0 : i32, i32
  }
  func.func @transform_7(%arg0: i32) -> (i32, i32) {
    %c0_i32 = arith.constant 0 : i32
    %c0_i32_0 = arith.constant 0 : i32
    return %arg0, %c0_i32 : i32, i32
  }
}

</mosaic_0001>

<bundles_post_ra>
// kernel: tpu_custom_call.1
= control target key start
LH: loop header
LB: loop body
LE: loop exit
PB: predicated region body
PF: predicated region fallthrough
CT: control target
= control target key end

     0   :  { %12 = vsyncpa [#allocation3], 0  ;;  %s1160_s0 = inlined_call_operand.vmem [shape: bf16[16,256], index: 0, kind: input, shape index: {}]   ;;  %s1161_s1 = inlined_call_operand.vmem [shape: bf16[256,128], index: 1, kind: input, shape index: {}]   ;;  %s1162_s2 = inlined_call_operand.vmem [shape: f32[1,128], index: 2, kind: input, shape index: {}]   ;;  %s1163_s3 = inlined_call_operand.hbm [shape: bf16[128,256], index: 3, kind: input, shape index: {}]   ;;  %s1164_s4 = inlined_call_operand.vmem [shape: f32[1,256], index: 4, kind: input, shape index: {}]   ;;  %s1165_s5 = inlined_call_operand.vmem [shape: bf16[128,4], index: 5, kind: input, shape index: {}]   ;;  %s1166_s6 = inlined_call_operand.vmem [shape: bf16[256,8], index: 6, kind: input, shape index: {}]   ;;  %s1167_s7 = inlined_call_operand.hbm [shape: f32[16,12], index: 7, kind: output, shape index: {}]  }
   0x1   :  { %13 = vsyncpa [#allocation4], 0  ;;  %s950_s24 = smov [#allocation2]   ;;  %s902_s28 = scalar_lea.hbm %s1163_s3, 2048 }
   0x2   :  { %s25_s25 = sshll.u32 %s950_s24, 4  ;;  %p903_p0 = scmp.ne.s32.totalorder %s1163_s3, %s902_s28  ;;  %s26_s25 = int_to_ptr.vmem [resolvable:$true] %s25_s25 }
   0x3   :  { %p906_p1 = scmp.lt.u32.totalorder %s902_s28, %s1163_s3 }
   0x5   :  { %p908_p2 = pnand %p906_p1, %p903_p0 }
   0x7   :  { %911 = shalt.err (!%p908_p2)
}
   0x8   :  { %s912_s10 = scalar_lea.vmem %s26_s25, 2048  ;;  %p917_p4 = scmp.lt.s32.totalorder %s26_s25, %s26_s25 }
   0x9   :  { %p913_p3 = scmp.ne.s32.totalorder %s26_s25, %s912_s10  ;;  %p918_p5 = scmp.lt.s32.totalorder %s912_s10, %s912_s10 }
   0xb   :  { %p919_p6 = por %p918_p5, %p917_p4 }
   0xd   :  { %p920_p7 = pnand %p919_p6, %p913_p3 }
   0xf   :  { %923 = shalt.err (!%p920_p7)
}
  0x10   :  { %s951_s11 = smov 128   ;;  %s952_s12 = smov 8  }
  0x11   :  { %31 = dma.hbm_to_vmem [thread:$0]  %s1163_s3, 2048, %s26_s25, [#allocation3], %s951_s11, %s951_s11, %s952_s12  }
  0x12   :  { %946 = dma.done.wait [#allocation3], 2048  }
  0x13   :  { %947 = vsyncadd [#allocation3], 4294965248  ;;  %v835_v0 = vld [vmem:[%s1161_s1 + $0x40] sm:$0xff]   ;;  %v837_v2 = vld [vmem:[%s1161_s1 + $0x48] sm:$0xff]   ;;  %v953_v29 = vmov 0.0   ;;  %v954_v43 = vmov 0  }
  0x14   :  { %v836_v1 = vld [vmem:[%s1161_s1] sm:$0xff]   ;;  %754 = vmatprep.subr.bf16.mxu0 %v835_v0  ;;  %v838_v3 = vld [vmem:[%s1161_s1 + $0x8] sm:$0xff]   ;;  %v839_v4 = vld [vmem:[%s1161_s1 + $0x50] sm:$0xff]   ;;  %373 = vmatprep.mubr.bf16.mxu1 %v954_v43  ;;  %vm955_vm0 = vmmov 0   ;;  %vm672_vm1 = vcmask 31744   ;;  %vm675_vm2 = vcmask 97280  }
  0x15   :  { %755 = vmatpush3.bf16.msra.mxu0 %v836_v1  ;;  %v840_v5 = vld [vmem:[%s1161_s1 + $0x10] sm:$0xff]   ;;  %v841_v6 = vld [vmem:[%s1161_s1 + $0x58] sm:$0xff]   ;;  %v843_v8 = vld [vmem:[%s1161_s1 + $0x60] sm:$0xff]  }
  0x16   :  { %756 = vmatprep.subr.bf16.mxu0 %v837_v2  ;;  %v842_v7 = vld [vmem:[%s1161_s1 + $0x18] sm:$0xff]   ;;  %v844_v9 = vld [vmem:[%s1161_s1 + $0x20] sm:$0xff]   ;;  %v845_v10 = vld [vmem:[%s1161_s1 + $0x68] sm:$0xff]  }
  0x17   :  { %v853_v11 = vld [vmem:[%s1160_s0 + $0x4] ss:$8 sps:$4 sm:$0xff]   ;;  %v856_v13 = vld [vmem:[#allocation2] ss:$8 sps:$4 sm:$0xff]   ;;  %v847_v15 = vld [vmem:[%s1161_s1 + $0x70] sm:$0xff]  }
  0x18   :  { %v854_v12 = vld [vmem:[#allocation2 + $0x4] ss:$8 sps:$4 sm:$0xff]   ;;  %221 = vmatprep.mubr.bf16.mxu0 %v853_v11  ;;  %v858_v16 = vld [vmem:[#allocation2 + $0x14] ss:$8 sps:$4 sm:$0xff]   ;;  %v860_v17 = vld [vmem:[#allocation2 + $0x10] ss:$8 sps:$4 sm:$0xff]  }
  0x19   :  { %757 = vmatpush3.bf16.msra.mxu0 %v838_v3  ;;  %v846_v14 = vld [vmem:[%s1161_s1 + $0x28] sm:$0xff]   ;;  %341 = vmatprep.subr.bf16.mxu1 %v854_v12  ;;  %v848_v19 = vld [vmem:[%s1161_s1 + $0x30] sm:$0xff]   ;;  %v849_v20 = vld [vmem:[%s1161_s1 + $0x78] sm:$0xff]  }
  0x1a   :  { %758 = vmatprep.subr.bf16.mxu0 %v839_v4  ;;  %342 = vmatpush1.bf16.msra.mxu1 %v856_v13  ;;  %v862_v18 = vld [vmem:[#allocation2 + $0x24] ss:$8 sps:$4 sm:$0xff]   ;;  %v864_v21 = vld [vmem:[#allocation2 + $0x20] ss:$8 sps:$4 sm:$0xff]   ;;  %v866_v22 = vld [vmem:[#allocation2 + $0x34] ss:$8 sps:$4 sm:$0xff]  }
  0x1b   :  { %343 = vmatprep.subr.bf16.mxu1 %v858_v16  ;;  %v850_v23 = vld [vmem:[%s1161_s1 + $0x38] sm:$0xff]   ;;  %v851_v25 = vld [vmem:[%s1160_s0] ss:$8 sps:$4 sm:$0xff]   ;;  %v870_v26 = vld [vmem:[#allocation2 + $0x44] ss:$8 sps:$4 sm:$0xff]  }
  0x1c   :  { %v868_v24 = vld [vmem:[#allocation2 + $0x30] ss:$8 sps:$4 sm:$0xff]   ;;  %v857_v27 = vld [vmem:[%s1165_s5] sm:$0xff]   ;;  %v861_v30 = vld [vmem:[%s1165_s5 + $0x8] sm:$0xff]  }
  0x1d   :  { %759 = vmatpush3.bf16.msra.mxu0 %v840_v5  ;;  %v872_v28 = vld [vmem:[#allocation2 + $0x40] ss:$8 sps:$4 sm:$0xff]   ;;  %v865_v31 = vld [vmem:[%s1165_s5 + $0x10] sm:$0xff]   ;;  %v869_v32 = vld [vmem:[%s1165_s5 + $0x18] sm:$0xff]  }
  0x1e   :  { %760 = vmatprep.subr.bf16.mxu0 %v841_v6  ;;  %344 = vmatpush1.bf16.msra.mxu1 %v860_v17  ;;  %v873_v33 = vld [vmem:[%s1165_s5 + $0x20] sm:$0xff]   ;;  %v874_v34 = vld [vmem:[#allocation2 + $0x54] ss:$8 sps:$4 sm:$0xff]   ;;  %v876_v35 = vld [vmem:[#allocation2 + $0x50] ss:$8 sps:$4 sm:$0xff]  }
  0x1f   :  { %345 = vmatprep.subr.bf16.mxu1 %v862_v18  ;;  %v877_v36 = vld [vmem:[%s1165_s5 + $0x28] sm:$0xff]   ;;  %v881_v39 = vld [vmem:[%s1165_s5 + $0x30] sm:$0xff]   ;;  %v885_v42 = vld [vmem:[%s1165_s5 + $0x38] sm:$0xff]  }
  0x20   :  { %v878_v37 = vld [vmem:[#allocation2 + $0x64] ss:$8 sps:$4 sm:$0xff]   ;;  %v880_v38 = vld [vmem:[#allocation2 + $0x60] ss:$8 sps:$4 sm:$0xff]   ;;  %v882_v40 = vld [vmem:[#allocation2 + $0x74] ss:$8 sps:$4 sm:$0xff]  }
  0x21   :  { %761 = vmatpush3.bf16.msra.mxu0 %v842_v7  ;;  %v884_v41 = vld [vmem:[#allocation2 + $0x70] ss:$8 sps:$4 sm:$0xff]   ;;  %v886_v44 = vld [vmem:[%s1166_s6 + $0x40] sm:$0xff]   ;;  %v888_v58 = vld [vmem:[%s1166_s6 + $0x48] sm:$0xff]  }
  0x22   :  { %762 = vmatprep.subr.bf16.mxu0 %v843_v8  ;;  %346 = vmatpush1.bf16.msra.mxu1 %v864_v21  ;;  %v695_v46 = vld [vmem:[%s1162_s2] ss:$0 sm:$0xff]  ;;  %v889_v59 = vld [vmem:[%s1166_s6 + $0x8] sm:$0xff]   ;;  %v890_v60 = vld [vmem:[%s1166_s6 + $0x50] sm:$0xff]   ;;  %v251_v8 = vlaneseq }
  0x23   :  { %347 = vmatprep.subr.bf16.mxu1 %v866_v22  ;;  %v887_v56 = vld [vmem:[%s1166_s6] sm:$0xff]   ;;  %v891_v61 = vld [vmem:[%s1166_s6 + $0x10] sm:$0xff]   ;;  %v892_v62 = vld [vmem:[%s1166_s6 + $0x58] sm:$0xff]  }
  0x24   :  { %v893_v63 = vld [vmem:[%s1166_s6 + $0x18] sm:$0xff]   ;;  %v894_v0 = vld [vmem:[%s1166_s6 + $0x60] sm:$0xff]   ;;  %v896_v2 = vld [vmem:[%s1166_s6 + $0x68] sm:$0xff]  }
  0x25   :  { %763 = vmatpush3.bf16.msra.mxu0 %v844_v9  ;;  %v895_v1 = vld [vmem:[%s1166_s6 + $0x20] sm:$0xff]   ;;  %v897_v3 = vld [vmem:[%s1166_s6 + $0x28] sm:$0xff]   ;;  %v898_v4 = vld [vmem:[%s1166_s6 + $0x70] sm:$0xff]   ;;  %v252_v9 = vshrl.u32 %v251_v8, 7 }
  0x26   :  { %764 = vmatprep.subr.bf16.mxu0 %v845_v10  ;;  %348 = vmatpush1.bf16.msra.mxu1 %v868_v24  ;;  %v899_v5 = vld [vmem:[%s1166_s6 + $0x30] sm:$0xff]   ;;  %v900_v6 = vld [vmem:[%s1166_s6 + $0x78] sm:$0xff]   ;;  %v249_v11 = vld [vmem:[%s1164_s4] sm:$0x3]  ;;  %s956_s4 = smov 4  }
  0x27   :  { %349 = vmatprep.subr.bf16.mxu1 %v870_v26  ;;  %v901_v7 = vld [vmem:[%s1166_s6 + $0x38] sm:$0xff]   ;;  %v253_v10 = vsub.s32 0, %v252_v9  ;;  %v257_v12 = vsub.s32 1, %v252_v9  ;;  %s957_s6 = smov [#allocation5]  }
  0x28   :  { %s683_s28 = sshll.u32 %s957_s6, 4  ;;  %s684_s28 = int_to_ptr.vmem [resolvable:$true] %s683_s28 }
  0x29   :  { %765 = vmatpush3.bf16.msra.mxu0 %v846_v14  ;;  %v254_v13 = vrot.slane %v249_v11, %v253_v10  ;;  %v258_v14 = vrot.slane %v249_v11, %v257_v12  ;;  %s924_s29 = scalar_lea.vmem %s684_s28, 256  ;;  %p929_p9 = scmp.lt.s32.totalorder %s684_s28, %s684_s28 }
  0x2a   :  { %766 = vmatprep.subr.bf16.mxu0 %v847_v15  ;;  %350 = vmatpush1.bf16.msra.mxu1 %v872_v28  ;;  %p925_p8 = scmp.ne.s32.totalorder %s684_s28, %s924_s29  ;;  %p930_p10 = scmp.lt.s32.totalorder %s924_s29, %s924_s29 }
  0x2b   :  { %351 = vmatprep.subr.bf16.mxu1 %v874_v34 }
  0x2c   :  { %p931_p11 = por %p930_p10, %p929_p9 }
  0x2d   :  { %767 = vmatpush3.bf16.msra.mxu0 %v848_v19 }
  0x2e   :  { %768 = vmatprep.subr.bf16.mxu0 %v849_v20  ;;  %352 = vmatpush1.bf16.msra.mxu1 %v876_v35  ;;  %p932_p12 = pnand %p931_p11, %p925_p8 }
  0x2f   :  { %353 = vmatprep.subr.bf16.mxu1 %v878_v37 }
  0x31   :  { %769 = vmatpush3.bf16.msra.mxu0 %v850_v23 }
  0x32   :  { %807 = vmatprep.subr.bf16.mxu0 %v953_v29  ;;  %354 = vmatpush1.bf16.msra.mxu1 %v880_v38 }
  0x33   :  { %355 = vmatprep.subr.bf16.mxu1 %v882_v40 }
  0x34   :  { %222 = vmatmul.mubr.bf16.vlgmr.msra.gmra.mrb[0].mxu0 %v851_v25 }
  0x35   :  { %808 = vmatpush3.bf16.msra.mxu0 %v857_v27  ;;  %823 = vmatprep.mubr.msk.bf16.mxu0 %vm955_vm0, %v953_v29 }
  0x36   :  { %809 = vmatprep.subr.bf16.mxu0 %v953_v29  ;;  %356 = vmatpush1.bf16.msra.mxu1 %v884_v41 }
  0x37   :  { %785 = vmatprep.subr.bf16.mxu1 %v886_v44 }
  0x39   :  { %810 = vmatpush3.bf16.msra.mxu0 %v861_v30 }
  0x3a   :  { %811 = vmatprep.subr.bf16.mxu0 %v953_v29 }
  0x3d   :  { %812 = vmatpush3.bf16.msra.mxu0 %v865_v31 }
  0x3e   :  { %813 = vmatprep.subr.bf16.mxu0 %v953_v29 }
  0x41   :  { %814 = vmatpush3.bf16.msra.mxu0 %v869_v32 }
  0x42   :  { %815 = vmatprep.subr.bf16.mxu0 %v953_v29 }
  0x45   :  { %816 = vmatpush3.bf16.msra.mxu0 %v873_v33 }
  0x46   :  { %817 = vmatprep.subr.bf16.mxu0 %v953_v29 }
  0x49   :  { %818 = vmatpush3.bf16.msra.mxu0 %v877_v36 }
  0x4a   :  { %819 = vmatprep.subr.bf16.mxu0 %v953_v29 }
  0x4d   :  { %820 = vmatpush3.bf16.msra.mxu0 %v881_v39 }
  0x4e   :  { %821 = vmatprep.subr.bf16.mxu0 %v953_v29 }
  0x51   :  { %822 = vmatpush3.bf16.msra.mxu0 %v885_v42 }
 0x107   :  { %v770_v45 = vpop.f32.mrb[0].mxu0 }
 0x108   :  { %v771_v47 = vpop.f32.mrb[1].mxu0 }
 0x109   :  { %v772_v48 = vadd.f32 %v771_v47, %v770_v45  ;;  %v773_v49 = vpop.f32.mrb[2].mxu0 }
 0x10a   :  { %v774_v50 = vpop.f32.mrb[3].mxu0 }
 0x10b   :  { %v224_v51 = vadd.f32 %v772_v48, %v695_v46  ;;  %v775_v52 = vadd.f32 %v774_v50, %v773_v49 }
 0x10d   :  { %v227_v53 = vadd.f32 %v775_v52, %v695_v46  ;;  %v230_v54 = vmax.f32 %v224_v51, 0.0 }
 0x10f   :  { %v231_v55 = vmax.f32 %v227_v53, 0.0 }
 0x111   :  { %v232_v57 = vpack.c.bf16 %v231_v55, %v230_v54 }
 0x113   :  { %374 = vmatmul.mubr.bf16.vlgmr.msra.gmra.mrb[0].mxu1 %v232_v57  ;;  %824 = vmatmul.mubr.bf16.vlgmr.msra.gmra.mrb[4].mxu0 %v232_v57 }
 0x114   :  { %786 = vmatpush3.bf16.msra.mxu1 %v887_v56 }
 0x115   :  { %787 = vmatprep.subr.bf16.mxu1 %v888_v58 }
 0x118   :  { %788 = vmatpush3.bf16.msra.mxu1 %v889_v59 }
 0x119   :  { %789 = vmatprep.subr.bf16.mxu1 %v890_v60 }
 0x11c   :  { %790 = vmatpush3.bf16.msra.mxu1 %v891_v61 }
 0x11d   :  { %791 = vmatprep.subr.bf16.mxu1 %v892_v62 }
 0x120   :  { %792 = vmatpush3.bf16.msra.mxu1 %v893_v63 }
 0x121   :  { %793 = vmatprep.subr.bf16.mxu1 %v894_v0 }
 0x124   :  { %794 = vmatpush3.bf16.msra.mxu1 %v895_v1 }
 0x125   :  { %795 = vmatprep.subr.bf16.mxu1 %v896_v2 }
 0x128   :  { %796 = vmatpush3.bf16.msra.mxu1 %v897_v3 }
 0x129   :  { %797 = vmatprep.subr.bf16.mxu1 %v898_v4 }
 0x12c   :  { %798 = vmatpush3.bf16.msra.mxu1 %v899_v5 }
 0x12d   :  { %799 = vmatprep.subr.bf16.mxu1 %v900_v6 }
 0x130   :  { %800 = vmatpush3.bf16.msra.mxu1 %v901_v7 }
 0x1e6   :  { %v375_v15 = vpop.f32.mrb[0].mxu1  ;;  %v488_v16 = vpop.f32.mrb[4].mxu0 }
 0x1e7   :  { %v376_v17 = vadd.f32 %v375_v15, %v254_v13  ;;  %v377_v18 = vpop.f32.mrb[1].mxu1  ;;  %v825_v19 = vpop.f32.mrb[5].mxu0 }
 0x1e8   :  { %v378_v20 = vadd.f32 %v377_v18, %v258_v14  ;;  %v379_v21 = vpop.f32.mrb[2].mxu1  ;;  %v491_v22 = vpop.f32.mrb[6].mxu0 }
 0x1e9   :  { %v380_v23 = vadd.f32 %v379_v21, %v254_v13  ;;  %v381_v24 = vpop.f32.mrb[3].mxu1  ;;  %v826_v25 = vpop.f32.mrb[7].mxu0  ;;  %v384_v27 = vmax.f32 %v376_v17, 0.0 }
 0x1ea   :  { %v382_v26 = vadd.f32 %v381_v24, %v258_v14  ;;  %v385_v29 = vmax.f32 %v378_v20, 0.0 }
 0x1eb   :  { %v386_v28 = vmax.f32 %v380_v23, 0.0 }
 0x1ec   :  { %v387_v30 = vmax.f32 %v382_v26, 0.0 }
 0x1ed   :  { %v388_v31 = vpack.c.bf16 %v386_v28, %v384_v27 }
 0x1ee   :  { %v389_v32 = vpack.c.bf16 %v387_v30, %v385_v29 }
 0x1f0   :  { %655 = vmatprep.mubr.bf16.mxu1 %v389_v32 }
 0x1f1   :  { %656 = vmatmul.mubr.bf16.vlgmr.msra.gmra.mrb[4].mxu1 %v388_v31 }
 0x2c4   :  { %v801_v33 = vpop.f32.mrb[4].mxu1 }
 0x2c5   :  { %v802_v34 = vpop.f32.mrb[5].mxu1 }
 0x2c6   :  { %v803_v35 = vadd.f32 %v802_v34, %v801_v33  ;;  %v804_v36 = vpop.f32.mrb[6].mxu1 }
 0x2c7   :  { %v805_v37 = vpop.f32.mrb[7].mxu1 }
 0x2c8   :  { %v806_v38 = vadd.f32 %v805_v37, %v804_v36  ;;  %666 = vrot.lane.b32.xlu0 %v803_v35, %s956_s4 }
 0x2cc   :  { %668 = vrot.lane.b32.xlu0 %v806_v38, %s956_s4 }
 0x33a   :  { %v667_v39 = vpop.permute.xlu0 %666 }
 0x33b   :  { %v673_v40 = vsel %vm672_vm1, %v488_v16, %v667_v39 }
 0x33c   :  { %676 = vst.msk [vmem:[#allocation5] sm:$0xff] %vm675_vm2, %v673_v40 }
 0x33e   :  { %v669_v41 = vpop.permute.xlu0 %668 }
 0x33f   :  { %v674_v42 = vsel %vm672_vm1, %v491_v22, %v669_v41 }
 0x340   :  { %677 = vst.msk [vmem:[#allocation5 + $0x8] sm:$0xff] %vm675_vm2, %v674_v42 }
 0x341   :  { %935 = shalt.err (!%p932_p12)
}
 0x342   :  { %s936_s0 = scalar_lea.hbm %s1167_s7, 256 }
 0x343   :  { %p937_p13 = scmp.ne.s32.totalorder %s1167_s7, %s936_s0  ;;  %p940_p0 = scmp.lt.u32.totalorder %s936_s0, %s1167_s7 }
 0x345   :  { %p942_p1 = pnand %p940_p0, %p937_p13 }
 0x347   :  { %945 = shalt.err (!%p942_p1)
}
 0x348   :  { %689 = dma.vmem_to_hbm [thread:$0]  %s684_s28, 256, %s1167_s7, [#allocation4], %s951_s11, %s951_s11, %s952_s12  }
 0x349   :  { %948 = dma.done.wait [#allocation4], 256  }
 0x34a   :  { %949 = vsyncadd [#allocation4], 4294967040 }
 0x34b   :  { %693 = vsyncpa [#allocation3], 1 }
 0x34c   :  { %694 = vsyncpa [#allocation4], 1 }

</bundles_post_ra>
